<compile_context>
chip_gen: v7x
topology: tpu7x:2x2x1
jax: 0.10.0
libtpu: 0.0.40
codegen_flags: <defaults>
</compile_context>

<pallas_src>
import math
from functools import partial

import jax
import jax.numpy as jnp
from jax.experimental import pallas as pl
from jax.experimental.pallas import tpu as pltpu


def _fuse_kernel(de_ref, en_ref, wde_ref, wen_ref, dup_ref, bias_ref, out_ref,
                 *, grp, tile_px, hw_total, precision):
    """One (batch, pixel-tile) grid step.

    de_ref  : (C_in,  P)     low-res de pixels (native dtype), P = tile_px
    en_ref  : (C_out, 4P)    skip connection at full resolution (native dtype)
    wde_ref : (C_out, C_in)  BN-folded conv weight, de part (compute dtype)
    wen_ref : (C_out, C_out) BN-folded conv weight, en part (compute dtype)
    dup_ref : (grp, 4*grp)   0/1 nearest-upsample selection (compute dtype)
    bias_ref: (C_out, 1)     BN-folded bias (f32)
    out_ref : (C_out, 4P)
    """
    cdt = wde_ref.dtype
    bias = bias_ref[...]                                    # (C_out, 1) f32
    ragged = (hw_total % tile_px) != 0                      # static
    tile_start = pl.program_id(1) * tile_px

    n_groups = -(-tile_px // grp)                           # static, small
    for g in range(n_groups):                               # short static loop
        c0 = g * grp
        cols = min(grp, tile_px - c0)

        # de contribution at low resolution (f32 accumulation).
        de_g = de_ref[:, c0:c0 + cols].astype(cdt)          # (C_in, cols)
        z = jnp.dot(wde_ref[...], de_g,
                    preferred_element_type=jnp.float32,
                    precision=precision)                    # (C_out, cols)

        if ragged:
            # Zero OOB columns of a ragged tail tile so the selection matmul
            # below cannot leak garbage (NaN/Inf) into valid output columns.
            col = jax.lax.broadcasted_iota(jnp.int32, z.shape, 1)
            z = jnp.where(col + (tile_start + c0) < hw_total, z, 0.0)

        # Fused x2 nearest upsample: exact 0/1 selection copy, one matmul per
        # group in the compute dtype (never emulated f32), lane-dense result.
        d = jnp.dot(z.astype(cdt), dup_ref[:cols, :4 * cols],
                    preferred_element_type=jnp.float32,
                    precision=precision)                    # (C_out, 4*cols)

        # en contribution at full resolution.
        en_g = en_ref[:, 4 * c0:4 * (c0 + cols)].astype(cdt)
        e = jnp.dot(wen_ref[...], en_g,
                    preferred_element_type=jnp.float32,
                    precision=precision)                    # (C_out, 4*cols)

        # Streamed epilogue: bias + ReLU + one lane-dense slab store.
        out_ref[:, 4 * c0:4 * (c0 + cols)] = jnp.maximum(
            d + e + bias, 0.0).astype(out_ref.dtype)


def _vmem_info():
    """(scoped vmem limit to request, working-set budget for tile sizing)."""
    try:
        phys = int(pltpu.get_tpu_info().vmem_capacity_bytes)
    except Exception:
        phys = 64 * 1024 * 1024                 # conservative default (v7x)
    limit = min((phys * 3) // 4, 100 * 1024 * 1024)   # ~48 MiB v7x / ~96 MiB v5e,v6e
    budget = (phys * 2) // 5                    # ~25 MiB v7x / ~51 MiB v5e,v6e
    return limit, budget


def _rows_per_group(w, h):
    """Source rows per upsample group: smallest count spanning >= 128 lanes."""
    if w >= 128:
        return 1
    return max(1, min(h, -(-128 // w)))


def _pick_tile(hw, grp, c_in, c_out, in_bytes, out_bytes, budget):
    """Largest group-aligned source-pixel tile whose double-buffered working
    set fits the VMEM budget (capped to keep the static group loop short)."""
    per_px = 2 * (c_in * in_bytes + 4 * c_out * in_bytes + 4 * c_out * out_bytes)
    fixed = (4 * (c_out * (c_in + c_out + 1))          # resident folded weights/bias
             + 4 * grp * 4 * grp                       # resident dup matrix
             + 8 * 4 * c_out * grp * 4)                # per-group f32 temporaries
    if fixed + hw * per_px <= budget:
        return hw                                      # whole image per grid step
    p = max(grp, ((budget - fixed) // per_px) // grp * grp)
    unit = grp * 128 // math.gcd(grp, 128)             # group- and lane-aligned
    if p >= unit:
        p = (p // unit) * unit
    return min(p, 32 * grp)                            # cap static group count


def decoder_block_forward(de, en, params, *, pixels_per_tile=None,
                          compute_dtype=jnp.bfloat16, out_dtype=None):
    """de: (N, C_in, H, W); en: (N, C_out, 2H, 2W); C_out = C_in // 2 (NCHW).

    compute_dtype: matmul operand dtype (bf16 recommended; None = de.dtype).
    out_dtype:     output dtype (None = de.dtype).  On v5e/v6e, pass bf16 if
                   the consumer accepts it -- the output is the largest HBM
                   write.
    """
    N, C_in, H, W = de.shape
    C_out = C_in // 2
    assert C_out * 2 == C_in, "decoder block requires out_channel == in_channel // 2"
    assert en.shape == (N, C_out, 2 * H, 2 * W)
    if compute_dtype is None:
        compute_dtype = de.dtype
    if out_dtype is None:
        out_dtype = de.dtype
    compute_dtype = jnp.dtype(compute_dtype)
    # f32 compute path: exact multi-pass MXU arithmetic (tight validation);
    # bf16 fast path uses the native single-pass MXU mode.
    precision = (jax.lax.Precision.HIGHEST
                 if compute_dtype == jnp.float32 else None)

    f32 = jnp.float32
    # ---- Fold eval-mode BatchNorm into the bias-free 1x1 conv (in f32). ----
    # TODO(synk): training-mode BN (batch statistics + running-stat updates)
    # is not implemented; this is the inference path.
    conv_w = params["conv_w"][:, :, 0, 0].astype(f32)          # (C_out, C_in+C_out)
    scale = params["bn_gamma"].astype(f32) / jnp.sqrt(
        params["bn_var"].astype(f32) + params["bn_eps"])
    w = conv_w * scale[:, None]
    bias = (params["bn_beta"].astype(f32)
            - params["bn_mean"].astype(f32) * scale).reshape(C_out, 1)
    w_de = w[:, :C_in].astype(compute_dtype)                   # (C_out, C_in)
    w_en = w[:, C_in:].astype(compute_dtype)                   # (C_out, C_out)

    # ---- Group geometry & VMEM-aware tile size. -----------------------------
    HW = H * W
    grp = _rows_per_group(W, H) * W          # source pixels per dup group
    vmem_limit, budget = _vmem_info()
    in_bytes = de.dtype.itemsize
    out_bytes = jnp.dtype(out_dtype).itemsize
    if pixels_per_tile is not None:
        P = pixels_per_tile
    else:
        P = _pick_tile(HW, grp, C_in, C_out, in_bytes, out_bytes, budget)
        # v7x shards "parallel" grid axes over 2 TensorCores: give a
        # single-image, single-tile problem at least 2 grid steps.
        if N == 1 and P >= HW and HW > grp:
            half = -(-(HW // 2) // grp) * grp
            if grp <= half < HW and half % 128 == 0:
                P = half
    assert P % W == 0, "pixel tile must be row-aligned (multiple of W)"
    assert P >= HW or P % grp == 0, "pixel tile must be a multiple of the row group"
    n_tiles = pl.cdiv(HW, P)                 # ragged tail handled in-kernel

    # ---- Constant 0/1 nearest-upsample selection matrix (one row group). ----
    # Block-diagonal per source row: output col q (of 4W per row) reads source
    # col (q % 2W) // 2 of the same row.  Exact copy in the compute dtype.
    j = jnp.arange(grp)[:, None]
    q = jnp.arange(4 * grp)[None, :]
    dup = (((j // W) == (q // (4 * W))) &
           ((j % W) == ((q % (2 * W)) // 2))).astype(compute_dtype)

    # ---- Free reshapes only: flatten pixels, keep native dtype. -------------
    de_f = de.reshape(N, C_in, HW)
    en_f = en.reshape(N, C_out, 4 * HW)

    kernel = partial(_fuse_kernel, grp=grp, tile_px=P, hw_total=HW,
                     precision=precision)

    # NOTE: on 128-MiB VMEM parts (v5e/v6e) a deeper en pipeline
    # (pipeline_mode=pl.Buffered(3) on the en spec) can be swept if profiling
    # shows exposed DMA; kept at the default depth here for v7x VMEM headroom.
    out_f = pl.pallas_call(
        kernel,
        out_shape=jax.ShapeDtypeStruct((N, C_out, 4 * HW), out_dtype),
        grid=(N, n_tiles),
        in_specs=[
            pl.BlockSpec((None, C_in, P), lambda n, i: (n, 0, i)),
            pl.BlockSpec((None, C_out, 4 * P), lambda n, i: (n, 0, i)),
            # constant index maps -> fetched once, kept resident in VMEM
            pl.BlockSpec((C_out, C_in), lambda n, i: (0, 0)),
            pl.BlockSpec((C_out, C_out), lambda n, i: (0, 0)),
            pl.BlockSpec((grp, 4 * grp), lambda n, i: (0, 0)),
            pl.BlockSpec((C_out, 1), lambda n, i: (0, 0)),
        ],
        out_specs=pl.BlockSpec((None, C_out, 4 * P), lambda n, i: (n, 0, i)),
        compiler_params=pltpu.CompilerParams(
            dimension_semantics=("parallel", "parallel"),
            vmem_limit_bytes=vmem_limit,
        ),
    )(de_f, en_f, w_de, w_en, dup, bias)

    # Free reshape back to NCHW at full resolution.
    return out_f.reshape(N, C_out, 2 * H, 2 * W)


def _reference_forward(de, en, params):
    """Pure-JAX reference mirroring the PyTorch forward (BN in eval mode)."""
    de_up = jnp.repeat(jnp.repeat(de, 2, axis=2), 2, axis=3)
    x = jnp.concatenate([de_up, en], axis=1)                  # (N, C_in+C_out, 2H, 2W)
    w = params["conv_w"][:, :, 0, 0]                          # (C_out, C_in+C_out)
    y = jnp.einsum("oc,nchw->nohw", w, x, precision=jax.lax.Precision.HIGHEST)
    scale = params["bn_gamma"] / jnp.sqrt(params["bn_var"] + params["bn_eps"])
    y = (y - params["bn_mean"][None, :, None, None]) * scale[None, :, None, None] \
        + params["bn_beta"][None, :, None, None]
    return jnp.maximum(y, 0.0)


if __name__ == "__main__":
    key = jax.random.PRNGKey(0)
    k_de, k_en, k_w, k_g, k_b, k_m, k_v, k_de2, k_en2 = jax.random.split(key, 9)

    # ---- Test 1: small shapes; bf16 fast path + f32 validation path. -------
    N, C_in, H, W = 2, 8, 8, 8
    C_out = C_in // 2        # 4

    de = jax.random.normal(k_de, (N, C_in, H, W), dtype=jnp.float32)
    en = jax.random.normal(k_en, (N, C_out, 2 * H, 2 * W), dtype=jnp.float32)

    params = {
        "conv_w": 0.1 * jax.random.normal(k_w, (C_out, C_in + C_out, 1, 1), dtype=jnp.float32),
        "bn_gamma": 1.0 + 0.05 * jax.random.normal(k_g, (C_out,), dtype=jnp.float32),
        "bn_beta": 0.05 * jax.random.normal(k_b, (C_out,), dtype=jnp.float32),
        "bn_mean": 0.1 * jax.random.normal(k_m, (C_out,), dtype=jnp.float32),
        "bn_var": jnp.abs(jax.random.normal(k_v, (C_out,), dtype=jnp.float32)) + 0.5,
        "bn_eps": 1e-5,
    }

    ref = _reference_forward(de, en, params)

    # Fast path: bf16 operands, f32 accumulation, in-kernel casts.
    out = jax.block_until_ready(decoder_block_forward(de, en, params))
    assert out.shape == (N, C_out, 2 * H, 2 * W)
    assert out.dtype == de.dtype
    assert jnp.allclose(out, ref, atol=3e-2, rtol=3e-2), "bf16 kernel mismatch vs reference"

    # Full-precision path (exact MXU mode) for tight numerical validation.
    out_f32 = jax.block_until_ready(
        decoder_block_forward(de, en, params, compute_dtype=None))
    assert jnp.allclose(out_f32, ref, atol=1e-4, rtol=1e-4), "f32 kernel mismatch vs reference"

    # ---- Test 2: N=1 (exercises the 2-TensorCore tile split), multiple row
    # groups per tile and a ragged tail (HW=320 over 256-pixel tiles). -------
    N2, H2, W2 = 1, 40, 8
    de2 = jax.random.normal(k_de2, (N2, C_in, H2, W2), dtype=jnp.float32)
    en2 = jax.random.normal(k_en2, (N2, C_out, 2 * H2, 2 * W2), dtype=jnp.float32)
    ref2 = _reference_forward(de2, en2, params)
    out2 = jax.block_until_ready(decoder_block_forward(de2, en2, params))
    assert out2.shape == (N2, C_out, 2 * H2, 2 * W2)
    assert jnp.allclose(out2, ref2, atol=3e-2, rtol=3e-2), "ragged-tail kernel mismatch"

    print("KERNEL_OK")
</pallas_src>

<mosaic_0001>
module attributes {stable_mosaic.version = 11 : i64} {
  func.func @_fuse_kernel(%arg0: i32, %arg1: i32, %arg2: memref<1x8x64xf32, #tpu.memory_space<vmem>>, %arg3: memref<1x4x256xf32, #tpu.memory_space<vmem>>, %arg4: memref<4x8xbf16, #tpu.memory_space<vmem>>, %arg5: memref<4x4xbf16, #tpu.memory_space<vmem>>, %arg6: memref<64x256xbf16, #tpu.memory_space<vmem>>, %arg7: memref<4x1xf32, #tpu.memory_space<vmem>>, %arg8: memref<1x4x256xf32, #tpu.memory_space<vmem>>) attributes {dimension_semantics = [#tpu.dimension_semantics<parallel>, #tpu.dimension_semantics<parallel>], iteration_bounds = array<i64: 2, 1>, scalar_prefetch = 0 : i64, scratch_operands = 0 : i64, tpu.core_type = #tpu.core_type<tc>, window_params = [{transform_indices = @transform_0, window_bounds = array<i64: 1, 8, 64>}, {transform_indices = @transform_1, window_bounds = array<i64: 1, 4, 256>}, {pipeline_mode = #tpu.pipeline_mode<synchronous>, transform_indices = @transform_2, window_bounds = array<i64: 4, 8>}, {pipeline_mode = #tpu.pipeline_mode<synchronous>, transform_indices = @transform_3, window_bounds = array<i64: 4, 4>}, {pipeline_mode = #tpu.pipeline_mode<synchronous>, transform_indices = @transform_4, window_bounds = array<i64: 64, 256>}, {pipeline_mode = #tpu.pipeline_mode<synchronous>, transform_indices = @transform_5, window_bounds = array<i64: 4, 1>}, {transform_indices = @transform_6, window_bounds = array<i64: 1, 4, 256>}]} {
    %c0 = arith.constant 0 : index
    %c0_0 = arith.constant 0 : index
    %0 = vector.load %arg7[%c0, %c0_0] : memref<4x1xf32, #tpu.memory_space<vmem>>, vector<4x1xf32>
    %c0_1 = arith.constant 0 : index
    %c0_2 = arith.constant 0 : index
    %c0_3 = arith.constant 0 : index
    %1 = vector.load %arg2[%c0_1, %c0_2, %c0_3] : memref<1x8x64xf32, #tpu.memory_space<vmem>>, vector<1x8x64xf32>
    %2 = vector.shape_cast %1 : vector<1x8x64xf32> to vector<8x64xf32>
    %3 = arith.truncf %2 : vector<8x64xf32> to vector<8x64xbf16>
    %c0_4 = arith.constant 0 : index
    %c0_5 = arith.constant 0 : index
    %4 = vector.load %arg4[%c0_4, %c0_5] : memref<4x8xbf16, #tpu.memory_space<vmem>>, vector<4x8xbf16>
    %cst = arith.constant dense<0.000000e+00> : vector<4x64xf32>
    %5 = tpu.matmul %4, %3, %cst {dimension_numbers = #tpu.dot_dimension_numbers<[1], [0], [0], [1], [0, 0, 1, 1], [], []>} : vector<4x8xbf16>, vector<8x64xbf16>, vector<4x64xf32> -> vector<4x64xf32>
    %6 = arith.truncf %5 : vector<4x64xf32> to vector<4x64xbf16>
    %c0_6 = arith.constant 0 : index
    %c0_7 = arith.constant 0 : index
    %7 = vector.load %arg6[%c0_6, %c0_7] : memref<64x256xbf16, #tpu.memory_space<vmem>>, vector<64x256xbf16>
    %cst_8 = arith.constant dense<0.000000e+00> : vector<4x256xf32>
    %8 = tpu.matmul %6, %7, %cst_8 {dimension_numbers = #tpu.dot_dimension_numbers<[1], [0], [0], [1], [0, 0, 1, 1], [], []>} : vector<4x64xbf16>, vector<64x256xbf16>, vector<4x256xf32> -> vector<4x256xf32>
    %c0_9 = arith.constant 0 : index
    %c0_10 = arith.constant 0 : index
    %c0_11 = arith.constant 0 : index
    %9 = vector.load %arg3[%c0_9, %c0_10, %c0_11] : memref<1x4x256xf32, #tpu.memory_space<vmem>>, vector<1x4x256xf32>
    %10 = vector.shape_cast %9 : vector<1x4x256xf32> to vector<4x256xf32>
    %11 = arith.truncf %10 : vector<4x256xf32> to vector<4x256xbf16>
    %c0_12 = arith.constant 0 : index
    %c0_13 = arith.constant 0 : index
    %12 = vector.load %arg5[%c0_12, %c0_13] : memref<4x4xbf16, #tpu.memory_space<vmem>>, vector<4x4xbf16>
    %cst_14 = arith.constant dense<0.000000e+00> : vector<4x256xf32>
    %13 = tpu.matmul %12, %11, %cst_14 {dimension_numbers = #tpu.dot_dimension_numbers<[1], [0], [0], [1], [0, 0, 1, 1], [], []>} : vector<4x4xbf16>, vector<4x256xbf16>, vector<4x256xf32> -> vector<4x256xf32>
    %14 = arith.addf %8, %13 : vector<4x256xf32>
    %15 = vector.broadcast %0 : vector<4x1xf32> to vector<4x256xf32>
    %16 = arith.addf %14, %15 : vector<4x256xf32>
    %cst_15 = arith.constant 0.000000e+00 : f32
    %17 = vector.broadcast %cst_15 : f32 to vector<4x256xf32>
    %18 = arith.maximumf %16, %17 : vector<4x256xf32>
    %c0_16 = arith.constant 0 : index
    %c0_17 = arith.constant 0 : index
    %c0_18 = arith.constant 0 : index
    %19 = vector.load %arg8[%c0_16, %c0_17, %c0_18] : memref<1x4x256xf32, #tpu.memory_space<vmem>>, vector<1x4x256xf32>
    %20 = vector.shape_cast %19 : vector<1x4x256xf32> to vector<4x256xf32>
    %21 = vector.shape_cast %18 : vector<4x256xf32> to vector<1x4x256xf32>
    tpu.vector_store %arg8[%c0_16, %c0_17, %c0_18], %21 {strides = array<i32>} : memref<1x4x256xf32, #tpu.memory_space<vmem>>, vector<1x4x256xf32>,
    return
  }
  func.func @transform_0(%arg0: i32, %arg1: i32) -> (i32, i32, i32) {
    %c0_i32 = arith.constant 0 : i32
    %c0_i32_0 = arith.constant 0 : i32
    return %arg0, %c0_i32, %arg1 : i32, i32, i32
  }
  func.func @transform_1(%arg0: i32, %arg1: i32) -> (i32, i32, i32) {
    %c0_i32 = arith.constant 0 : i32
    %c0_i32_0 = arith.constant 0 : i32
    return %arg0, %c0_i32, %arg1 : i32, i32, i32
  }
  func.func @transform_2(%arg0: i32, %arg1: i32) -> (i32, i32) {
    %c0_i32 = arith.constant 0 : i32
    %c0_i32_0 = arith.constant 0 : i32
    %c0_i32_1 = arith.constant 0 : i32
    return %c0_i32, %c0_i32_0 : i32, i32
  }
  func.func @transform_3(%arg0: i32, %arg1: i32) -> (i32, i32) {
    %c0_i32 = arith.constant 0 : i32
    %c0_i32_0 = arith.constant 0 : i32
    %c0_i32_1 = arith.constant 0 : i32
    return %c0_i32, %c0_i32_0 : i32, i32
  }
  func.func @transform_4(%arg0: i32, %arg1: i32) -> (i32, i32) {
    %c0_i32 = arith.constant 0 : i32
    %c0_i32_0 = arith.constant 0 : i32
    %c0_i32_1 = arith.constant 0 : i32
    return %c0_i32, %c0_i32_0 : i32, i32
  }
  func.func @transform_5(%arg0: i32, %arg1: i32) -> (i32, i32) {
    %c0_i32 = arith.constant 0 : i32
    %c0_i32_0 = arith.constant 0 : i32
    %c0_i32_1 = arith.constant 0 : i32
    return %c0_i32, %c0_i32_0 : i32, i32
  }
  func.func @transform_6(%arg0: i32, %arg1: i32) -> (i32, i32, i32) {
    %c0_i32 = arith.constant 0 : i32
    %c0_i32_0 = arith.constant 0 : i32
    return %arg0, %c0_i32, %arg1 : i32, i32, i32
  }
}

</mosaic_0001>

<bundles_post_ra>
// kernel: tpu_custom_call.1
= control target key start
LH: loop header
LB: loop body
LE: loop exit
PB: predicated region body
PF: predicated region fallthrough
CT: control target
= control target key end

     0   :  { %s1319_s0 = inlined_call_operand.hbm [shape: f32[2,8,64], index: 0, kind: input, shape index: {}]   ;;  %s1320_s1 = inlined_call_operand.hbm [shape: f32[2,4,256], index: 1, kind: input, shape index: {}]   ;;  %s1321_s2 = inlined_call_operand.vmem [shape: bf16[4,8], index: 2, kind: input, shape index: {}]   ;;  %s1322_s3 = inlined_call_operand.vmem [shape: bf16[4,4], index: 3, kind: input, shape index: {}]   ;;  %s1323_s4 = inlined_call_operand.hbm [shape: bf16[64,256], index: 4, kind: input, shape index: {}]   ;;  %s1324_s5 = inlined_call_operand.vmem [shape: f32[4,1], index: 5, kind: input, shape index: {}]   ;;  %s1325_s6 = inlined_call_operand.hbm [shape: f32[2,4,256], index: 6, kind: output, shape index: {}]  }
   0x1   :  { %1333 = sst [smem:[#allocation17_spill]] %s1323_s4 }
   0x2   :  { %11 = vsyncpa [#allocation3], 0 }
   0x3   :  { %13 = vsyncpa [#allocation3 + $0x1], 0 }
   0x4   :  { %14 = vsyncpa [#allocation6], 0 }
   0x5   :  { %16 = vsyncpa [#allocation6 + $0x1], 0 }
   0x6   :  { %17 = vsyncpa [#allocation4], 0 }
   0x7   :  { %19 = vsyncpa [#allocation4 + $0x1], 0  ;;  %s1059_s21 = smov 0   ;;  %s1061_s22 = smov 0  }
   0x8   :  { %s1063_s23 = smov 0   ;;  %s1065_s24 = smov 0  }
   0x9   :  { %s1067_s25 = smov 0   ;;  %s1069_s26 = smov 0  }
   0xa LB: > { %1334 = sst [smem:[#allocation13_spill]] %s1001_s23  ;;  %s1090_s27 = sadd.s32 4294967295, %s1013_s26   ;;  %s1013_s26 = sphi %s1069_s26, %s25_s26   ;;  %s1009_s25 = sphi %s1067_s25, %s1357_s25   ;;  %s1005_s24 = sphi %s1065_s24, %s1356_s24   ;;  %s1001_s23 = sphi %s1063_s23, %s1355_s23   ;;  %s997_s22 = sphi %s1061_s22, %s1359_s22   ;;  %s993_s21 = sphi %s1059_s21, %s1358_s21  }
   0xb   : > { %1335 = sst [smem:[#allocation14_spill]] %s1009_s25  ;;  %s697_s28 = sadd.s32 4294967294, %s1013_s26  }
   0xc   : > { %p59_p0 = scmp.ne.s32.totalorder %s997_s22, %s993_s21  ;;  %p1326_p1 = scmp.eq.s32.totalorder %s1090_s27, 0 }
   0xd   : > { %p203_p3 = scmp.eq.s32.totalorder %s697_s28, 1  ;;  %p698_p5 = scmp.ge.s32.totalorder %s1013_s26, 1 }
   0xe   : > { %p1099_p4 = por %p1326_p1, %p59_p0  ;;  %p210_p7 = scmp.lt.s32.totalorder %s1013_s26, 3 }
   0xf   : > { %p1104_p6 = por %p203_p3, %p59_p0  ;;  %s1015_s8 = smov [#allocation7]  }
  0x10   : > { %s1336_s29 = scalar_select %p1099_p4, 1, 0 }
  0x11   : > { %s1337_s30 = scalar_select %p1104_p6, 1, 0 }
  0x12   : > { %p1109_p8 = pnand %p698_p5, %p210_p7  ;;  %s228_s9 = sshll.u32 %s1015_s8, 4  ;;  %s229_s9 = int_to_ptr.vmem [resolvable:$true] %s228_s9 }
  0x13   : > { %s37_s11 = sadd.s32 1, %s1009_s25  ;;  %s1340_s4 = sld [smem:[#allocation17_spill]] }
  0x14   : > { %s1338_s7 = scalar_select %p1109_p8, 1, 0 }
  0x15   : > { %p748_p9 = pneg %p1109_p8 }
  0x17   : > { %p1118_p11 = pnand %p748_p9, %p1326_p1 }
  0x19   : > { %s835_s14 = scalar_lea.hbm %s1340_s4, 1024  ;;  %p837_p13 = pneg %p1118_p11 }
  0x1a   : > { %p836_p12 = scmp.ne.s32.totalorder %s1340_s4, %s835_s14  ;;  %p842_p5 = scmp.lt.u32.totalorder %s835_s14, %s1340_s4 }
  0x1c   : > { %p838_p0 = pnand %p837_p13, %p836_p12 }
  0x1e   : > { %p839_p3 = pneg %p838_p0 }
  0x20   : > { %p844_p7 = pnand %p842_p5, %p839_p3 }
  0x22   : > { %847 = shalt.err (!%p844_p7)
}
  0x23   : > { %s848_s19 = scalar_lea.vmem %s229_s9, 1024  ;;  %p856_p2 = scmp.lt.s32.totalorder %s229_s9, %s229_s9 }
  0x24   : > { %p849_p9 = scmp.ne.s32.totalorder %s229_s9, %s848_s19  ;;  %p857_p6 = scmp.lt.s32.totalorder %s848_s19, %s848_s19 }
  0x26   : > { %p851_p10 = pnand %p849_p9, %p837_p13  ;;  %p858_p4 = por %p857_p6, %p856_p2 }
  0x28   : > { %p852_p1 = pneg %p851_p10 }
  0x2a   : > { %p859_p8 = pnand %p858_p4, %p852_p1 }
  0x2c   : > { %862 = shalt.err (!%p859_p8)
}
  0x2d   : > { %s1016_s20 = smov 128   ;;  %s1017_s28 = smov 8  }
  0x2e   : > { %751 = dma.hbm_to_vmem [thread:$0]  (!%p1118_p11), %s1340_s4, 1024, %s229_s9, [#allocation6], %s1016_s20, %s1016_s20, %s1017_s28  }
  0x2f   : > { %p39_p1 = scmp.ge.s32.totalorder %s37_s11, 2  ;;  %s46_s13 = sadd.s32 1, %s1001_s23 }
  0x30   : > { %p53_p2 = scmp.ne.s32.totalorder %s1001_s23, %s997_s22  ;;  %p54_p4 = scmp.eq.s32.totalorder %s1013_s26, 0 }
  0x31   : > { %s1361_s11 = smov (%p39_p1, %s37_s11), 0  ;;  %p1343_p8 = scmp.eq.s32.totalorder %s1090_s27, 1 }
  0x32   : > { %1341 = sst [smem:[#allocation15_spill]] %s1361_s11  ;;  %p1145_p6 = por %p54_p4, %p53_p2 }
  0x33   : > { %p1151_p10 = por %p1343_p8, %p53_p2  ;;  %s41_s15 = ssub.s32 %s1009_s25, %s1361_s11 }
  0x34   : > { %p764_p11 = scmp.lt.s32.totalorder %s1013_s26, 2  ;;  %p44_p12 = scmp.eq.s32.totalorder %s41_s15, 0 }
  0x35   : > { %s1344_s10 = scalar_select %p1151_p10, 1, 0 }
  0x36   : > { %s245_s9 = sand.u32 1, %s1001_s23   ;;  %s702_s18 = sshll.u32 %s1009_s25, 7 }
  0x37   : > { %s1159_s16 = sshll.u32 %s245_s9, 3  ;;  %s1168_s28 = scalar_lea.hbm %s1319_s0, %s702_s18 }
  0x38   : > { %s1162_s17 = scalar_select %p44_p12, %s1001_s23, %s46_s13  }
  0x39   : > { %s249_s8 = scalar_lea.vmem [#allocation2], %s1159_s16  ;;  %p1175_p13 = pnand %p764_p11, %p1145_p6 }
  0x3a   : > { %1345 = sst [smem:[#allocation16_spill]] %s1162_s17  ;;  %s257_s12 = sshll.u32 %s249_s8, 4  ;;  %s1171_s12 = int_to_ptr.vmem [resolvable:$true] %s257_s12 }
  0x3b   : > { %s1182_s19 = scalar_lea.hbm %s1320_s1, %s702_s18  ;;  %s264_s20 = sand.u32 1, %s1013_s26  }
  0x3c   : > { %s246_s11 = scalar_lea.sflag [#allocation3], %s245_s9  ;;  %s863_s25 = scalar_lea.hbm %s1168_s28, 128 }
  0x3d   : > { %p864_p0 = scmp.ne.s32.totalorder %s1168_s28, %s863_s25  ;;  %p865_p3 = pneg %p1175_p13 }
  0x3e   : > { %s868_s17 = scalar_lea.hbm %s1319_s0, 256  ;;  %p869_p9 = scmp.lt.u32.totalorder %s1168_s28, %s1319_s0 }
  0x3f   : > { %p866_p5 = pnand %p865_p3, %p864_p0  ;;  %p870_p1 = scmp.lt.u32.totalorder %s868_s17, %s863_s25 }
  0x40   : > { %p872_p4 = scmp.lt.u32.totalorder %s863_s25, %s1168_s28 }
  0x41   : > { %p867_p7 = pneg %p866_p5  ;;  %p871_p2 = por %p870_p1, %p869_p9 }
  0x43   : > { %p873_p6 = por %p872_p4, %p871_p2 }
  0x45   : > { %p874_p8 = pnand %p873_p6, %p867_p7 }
  0x47   : > { %877 = shalt.err (!%p874_p8)
}
  0x48   : > { %s878_s9 = scalar_lea.vmem %s1171_s12, 128  ;;  %s1018_s18 = smov [#allocation2]  }
  0x49   : > { %p879_p11 = scmp.ne.s32.totalorder %s1171_s12, %s878_s9  ;;  %s883_s13 = sshll.u32 %s1018_s18, 4  ;;  %s884_s13 = int_to_ptr.vmem [resolvable:$false] %s883_s13 }
  0x4a   : > { %s885_s23 = scalar_lea.vmem %s884_s13, 256  ;;  %p886_p5 = scmp.lt.s32.totalorder %s1171_s12, %s884_s13 }
  0x4b   : > { %p881_p12 = pnand %p879_p11, %p865_p3  ;;  %p887_p9 = scmp.lt.s32.totalorder %s885_s23, %s878_s9 }
  0x4d   : > { %p882_p0 = pneg %p881_p12  ;;  %p888_p1 = por %p887_p9, %p886_p5 }
  0x4f   : > { %p889_p2 = pnand %p888_p1, %p882_p0 }
  0x51   : > { %892 = shalt.err (!%p889_p2)
}
  0x52   : > { %755 = dma.hbm_to_vmem [thread:$0]  (!%p1175_p13), %s1168_s28, 128, %s1171_s12, %s246_s11  }
  0x53   : > { %s268_s25 = scalar_lea.vmem [#allocation5], %s1159_s16  ;;  %s265_s14 = scalar_lea.sflag [#allocation6], %s264_s20 }
  0x54   : > { %s278_s17 = sshll.u32 %s268_s25, 4  ;;  %s893_s8 = scalar_lea.hbm %s1182_s19, 128  ;;  %s279_s17 = int_to_ptr.vmem [resolvable:$true] %s278_s17 }
  0x55   : > { %p894_p7 = scmp.ne.s32.totalorder %s1182_s19, %s893_s8  ;;  %s898_s18 = scalar_lea.hbm %s1320_s1, 256 }
  0x56   : > { %p899_p8 = scmp.lt.u32.totalorder %s1182_s19, %s1320_s1  ;;  %p900_p11 = scmp.lt.u32.totalorder %s898_s18, %s893_s8 }
  0x57   : > { %p896_p4 = pnand %p894_p7, %p865_p3  ;;  %p902_p0 = scmp.lt.u32.totalorder %s893_s8, %s1182_s19 }
  0x58   : > { %p901_p12 = por %p900_p11, %p899_p8 }
  0x59   : > { %p897_p6 = pneg %p896_p4 }
  0x5a   : > { %p903_p5 = por %p902_p0, %p901_p12 }
  0x5c   : > { %p904_p9 = pnand %p903_p5, %p897_p6 }
  0x5e   : > { %907 = shalt.err (!%p904_p9)
}
  0x5f   : > { %s908_s11 = scalar_lea.vmem %s279_s17, 128  ;;  %s1019_s16 = smov [#allocation5]  }
  0x60   : > { %p909_p1 = scmp.ne.s32.totalorder %s279_s17, %s908_s11  ;;  %s913_s28 = sshll.u32 %s1019_s16, 4  ;;  %s914_s28 = int_to_ptr.vmem [resolvable:$false] %s913_s28 }
  0x61   : > { %s915_s12 = scalar_lea.vmem %s914_s28, 256  ;;  %p916_p4 = scmp.lt.s32.totalorder %s279_s17, %s914_s28 }
  0x62   : > { %p911_p2 = pnand %p909_p1, %p865_p3  ;;  %p917_p10 = scmp.lt.s32.totalorder %s915_s12, %s908_s11 }
  0x64   : > { %p912_p7 = pneg %p911_p2  ;;  %p918_p8 = por %p917_p10, %p916_p4 }
  0x66   : > { %p919_p11 = pnand %p918_p8, %p912_p7 }
  0x68   : > { %922 = shalt.err (!%p919_p11)
}
  0x69   : > { %758 = dma.hbm_to_vmem [thread:$0]  (!%p1175_p13), %s1182_s19, 128, %s279_s17, %s265_s14  }
  0x6a   : > { %p1347_p6 = scmp.ne.s32.totalorder %s1338_s7, 0 }
  0x6b   : > { %s1235_s20 = sand.u32 (!%p1347_p6), 1, %s997_s22   ;;  %p1348_p10 = scmp.ne.s32.totalorder (!%p1347_p6), %s1336_s29, 0 }
  0x6c   : > { %287 = sbr.rel (%p1347_p6) target bundleno = 578 (0x242), region = 44  ;;  %s1238_s25 = sshll.u32 (!%p1347_p6), %s1235_s20, 3 }
  0x6d   : > { %s290_s8 = scalar_lea.sflag (!%p1347_p6), [#allocation3], %s1235_s20  ;;  %s293_s4 = scalar_lea.vmem (!%p1347_p6), [#allocation2], %s1238_s25 }
  0x73   : > { %976 = dma.done.wait (%p1348_p10), %s290_s8, 128  }
  0x74   : > { %978 = vsyncadd (%p1348_p10), %s290_s8, 4294967168  ;;  %s298_s7 = sand.u32 1, %s1090_s27   ;;  %s302_s19 = scalar_lea.vmem [#allocation5], %s1238_s25 }
  0x75   : > { %s299_s15 = scalar_lea.sflag [#allocation6], %s298_s7 }
  0x76   : > { %980 = dma.done.wait (%p1348_p10), %s299_s15, 128  }
  0x77   : > { %982 = vsyncadd (%p1348_p10), %s299_s15, 4294967168  ;;  %p1349_p13 = scmp.eq.s32.totalorder %s1090_s27, 0 }
  0x79   : > { %984 = dma.done.wait (%p1349_p13), [#allocation6], 1024   ;;  %p1350_p3 = pmov %p1349_p13 }
  0x7a   : > { %v1020_v0 = vmov 0.0   ;;  %vm1021_vm0 = vmmov 0   ;;  %v1022_v1 = vmov 0   ;;  %v344_v2 = vld [vmem:[%s293_s4] sm:$0xff]  ;;  %vm351_vm1 = vcmask 1043456   ;;  %v404_v8 = vld [vmem:[%s302_s19] sm:$0xff] }
  0x7b   : > { %986 = vsyncadd (%p1350_p3), [#allocation6], 4294966272  ;;  %732 = vmatprep.subr.bf16.mxu1 %v1020_v0  ;;  %734 = vmatprep.mubr.msk.bf16.mxu1 %vm1021_vm0, %v1020_v0  ;;  %v345_v3 = vpack.c.bf16 %v344_v2, %v344_v2  ;;  %v822_v4 = vld [vmem:[#allocation7 + $0x4] ss:$8 sps:$4 sm:$0xff]   ;;  %v824_v5 = vld [vmem:[#allocation7] ss:$8 sps:$4 sm:$0xff]   ;;  %v406_v11 = vcombine.high %v404_v8, %v404_v8  ;;  %v408_v12 = vpack.c.bf16 %v404_v8, %v404_v8 }
  0x7c   : > { %539 = vmatprep.mubr.bf16.mxu0 %v1022_v1  ;;  %821 = vset.pattern.permute.xlu0 %v1022_v1  ;;  %v825_v6 = vld [vmem:[#allocation7 + $0x14] ss:$8 sps:$4 sm:$0xff]   ;;  %vm415_vm2 = vcmask 1041408   ;;  %v346_v9 = vld [vmem:[%s1321_s2] sm:$0x3]  ;;  %vm347_vm3 = vcmask 64512  }
  0x7d   : > { %v353_v7 = vsel %vm351_vm1, %v345_v3, 0  ;;  %507 = vmatprep.subr.bf16.mxu0 %v822_v4  ;;  %v827_v10 = vld [vmem:[#allocation7 + $0x10] ss:$8 sps:$4 sm:$0xff]   ;;  %v829_v13 = vld [vmem:[#allocation7 + $0x24] ss:$8 sps:$4 sm:$0xff]   ;;  %v409_v14 = vpack.c.bf16 %v406_v11, %v406_v11  ;;  %v417_v15 = vsel %vm415_vm2, %v408_v12, 0 }
  0x7e   : > { %733 = vmatpush3.bf16.msra.mxu1 %v353_v7  ;;  %508 = vmatpush1.bf16.msra.mxu0 %v824_v5  ;;  %v831_v16 = vld [vmem:[#allocation7 + $0x20] ss:$8 sps:$4 sm:$0xff]   ;;  %v832_v17 = vld [vmem:[#allocation7 + $0x34] ss:$8 sps:$4 sm:$0xff]   ;;  %v834_v18 = vld [vmem:[#allocation7 + $0x30] ss:$8 sps:$4 sm:$0xff]  }
  0x7f   : > { %509 = vmatprep.subr.bf16.mxu0 %v825_v6  ;;  %712 = vmatprep.subr.msk.bf16.mxu1 %vm415_vm2, %v409_v14  ;;  %v410_v19 = vld [vmem:[%s1322_s3] sm:$0x3]  ;;  %vm411_vm4 = vcmask 31744   ;;  %vm503_vm5 = vcmask 523264   ;;  %s729_s13 = sshll.u32 %s1005_s24, 7  ;;  %s339_s23 = scalar_lea.vmem [#allocation8], %s1238_s25 }
  0x80   : > { %v343_v20 = vld [vmem:[%s1324_s5] sm:$0xf]  ;;  %s579_s11 = sshll.u32 %s339_s23, 4  ;;  %s1270_s12 = scalar_lea.hbm %s1325_s6, %s729_s13  ;;  %s1272_s11 = int_to_ptr.vmem [resolvable:$true] %s579_s11 }
  0x81   : > { %735 = vmatmul.mubr.msk.bf16.vlgmr.msra.gmra.mrb[0].mxu1 %vm347_vm3, %v346_v9  ;;  %550 = vperm.xlu0 %821, %v343_v20   ;;  %s563_s8 = scalar_lea.sflag [#allocation4], %s1235_s20  ;;  %s923_s4 = scalar_lea.vmem %s1272_s11, 128 }
  0x82   : > { %510 = vmatpush1.bf16.msra.mxu0 %v827_v10  ;;  %423 = vmatpush1.bf16.msra.mxu1 %v417_v15  ;;  %p924_p12 = scmp.ne.s32.totalorder %s1272_s11, %s923_s4  ;;  %p1351_p0 = scmp.ne.s32.totalorder %s1344_s10, 0 }
  0x83   : > { %511 = vmatprep.subr.bf16.mxu0 %v829_v13  ;;  %454 = vmatprep.mubr.bf16.mxu1 %v1022_v1  ;;  %s1023_s24 = smov [#allocation8]  }
  0x84   : > { %p925_p5 = pnand %p924_p12, %p1351_p0  ;;  %s927_s25 = sshll.u32 %s1023_s24, 4  ;;  %s928_s25 = int_to_ptr.vmem [resolvable:$false] %s927_s25 }
  0x85   : > { %s929_s7 = scalar_lea.vmem %s928_s25, 256  ;;  %p930_p1 = scmp.lt.s32.totalorder %s1272_s11, %s928_s25 }
  0x86   : > { %512 = vmatpush1.bf16.msra.mxu0 %v831_v16  ;;  %p926_p9 = pneg %p925_p5  ;;  %p931_p2 = scmp.lt.s32.totalorder %s929_s7, %s923_s4 }
  0x87   : > { %513 = vmatprep.subr.bf16.mxu0 %v832_v17 }
  0x88   : > { %p932_p7 = por %p931_p2, %p930_p1 }
  0x89   : > { %713 = vmatmul.mubr.msk.bf16.vlgmr.msra.gmra.mrb[4].mxu1 %vm411_vm4, %v410_v19 }
  0x8a   : > { %514 = vmatpush1.bf16.msra.mxu0 %v834_v18  ;;  %p933_p4 = pnand %p932_p7, %p926_p9 }
 0x100   : > { %v551_v31 = vpop.permute.xlu0 %550 }
 0x154   : > { %v389_v21 = vpop.f32.mrb[0].mxu1 }
 0x155   : > { %v395_v22 = vpack.c.bf16 %v389_v21, %v389_v21  ;;  %v736_v23 = vpop.f32.mrb[1].mxu1 }
 0x156   : > { %v392_v24 = vpop.f32.mrb[2].mxu1 }
 0x157   : > { %v737_v25 = vpop.f32.mrb[3].mxu1  ;;  %722 = vmatmul.mubr.msk.bf16.vlgmr.msra.gmra.mrb[0].mxu0 %vm503_vm5, %v395_v22 }
 0x15c   : > { %v456_v26 = vpop.f32.mrb[4].mxu1 }
 0x15d   : > { %v458_v27 = vpop.f32.mrb[5].mxu1 }
 0x15e   : > { %v460_v28 = vpop.f32.mrb[6].mxu1 }
 0x15f   : > { %v461_v29 = vpop.f32.mrb[7].mxu1 }
 0x22a   : > { %v541_v30 = vpop.f32.mrb[0].mxu0 }
 0x22b   : > { %v542_v32 = vadd.f32 %v541_v30, %v456_v26  ;;  %v543_v33 = vpop.f32.mrb[1].mxu0 }
 0x22c   : > { %v544_v34 = vadd.f32 %v543_v33, %v458_v27  ;;  %v545_v35 = vpop.f32.mrb[2].mxu0 }
 0x22d   : > { %v553_v36 = vadd.f32 %v551_v31, %v542_v32  ;;  %v546_v37 = vpop.f32.mrb[3].mxu0 }
 0x22e   : > { %v554_v38 = vadd.f32 %v551_v31, %v544_v34 }
 0x22f   : > { %v555_v39 = vmax.f32 %v553_v36, 0.0 }
 0x230   : > { %v556_v40 = vmax.f32 %v554_v38, 0.0 }
 0x232   : > { %v559_v41 = vcombine.low %v555_v39, %v556_v40 }
 0x234   : > { %561 = vst [vmem:[%s339_s23] sm:$0xff] %v559_v41 }
 0x235   : > { %936 = shalt.err (!%p933_p4)
}
 0x236   : > { %s937_s20 = scalar_lea.hbm %s1270_s12, 128  ;;  %s941_s27 = scalar_lea.hbm %s1325_s6, 256 }
 0x237   : > { %p938_p8 = scmp.ne.s32.totalorder %s1270_s12, %s937_s20  ;;  %p942_p10 = scmp.lt.u32.totalorder %s1270_s12, %s1325_s6 }
 0x238   : > { %p943_p13 = scmp.lt.u32.totalorder %s941_s27, %s937_s20  ;;  %p945_p12 = scmp.lt.u32.totalorder %s937_s20, %s1270_s12 }
 0x239   : > { %p939_p11 = pnand %p938_p8, %p1351_p0 }
 0x23a   : > { %p944_p3 = por %p943_p13, %p942_p10 }
 0x23b   : > { %p940_p6 = pneg %p939_p11 }
 0x23c   : > { %p946_p5 = por %p945_p12, %p944_p3 }
 0x23e   : > { %p947_p9 = pnand %p946_p5, %p940_p6 }
 0x240   : > { %950 = shalt.err (!%p947_p9)
}
 0x241   : > { %746 = dma.vmem_to_hbm [thread:$0]  (%p1351_p0), %s1272_s11, 128, %s1270_s12, %s563_s8  }
 0x242 PF: > { %s591_s14 = sand.u32 1, %s993_s21   ;;  %p1352_p1 = scmp.ne.s32.totalorder %s1337_s30, 0 }
 0x243   : > { %p1353_p2 = scmp.ge.s32.totalorder %s1013_s26, 2  ;;  %s592_s9 = scalar_lea.sflag [#allocation4], %s591_s14 }
 0x245   : > { %p760_p7 = pnand %p1353_p2, %p1352_p1 }
 0x247   : > { %988 = dma.done.wait (!%p760_p7), %s592_s9, 128  }
 0x248   : > { %990 = vsyncadd (!%p760_p7), %s592_s9, 4294967168  ;;  %s25_s26 = sadd.s32 1, %s1013_s26   ;;  %s1354_s18 = sld [smem:[#allocation13_spill]] }
 0x249   : > { %p22_p4 = scmp.ge.s32.totalorder %s25_s26, 4   ;;  %s1355_s23 = sld [smem:[#allocation16_spill]] }
 0x24a   : > { %s1356_s24 = sld [smem:[#allocation14_spill]]  ;;  %s1357_s25 = sld [smem:[#allocation15_spill]] }
 0x24b   : > { %s1358_s21 = smov %s997_s22  ;;  %24 = sbr.rel (!%p22_p4) target bundleno = 10 (0xa), region = 106 }
 0x24e   : > { %s1359_s22 = smov %s1354_s18 }
 0x252   :  { %597 = vsyncpa [#allocation3], 1 }
 0x253   :  { %599 = vsyncpa [#allocation3 + $0x1], 1 }
 0x254   :  { %600 = vsyncpa [#allocation6], 1 }
 0x255   :  { %602 = vsyncpa [#allocation6 + $0x1], 1 }
 0x256   :  { %603 = vsyncpa [#allocation4], 1 }
 0x257   :  { %605 = vsyncpa [#allocation4 + $0x1], 1 }

</bundles_post_ra>
